<compile_context>
chip_gen: v7x
topology: tpu7x:2x2x1
jax: 0.10.0
libtpu: 0.0.40
codegen_flags: <defaults>
</compile_context>

<pallas_src>
import functools

import jax
import jax.numpy as jnp
from jax.experimental import pallas as pl
from jax.experimental.pallas import tpu as pltpu


def _snn_kernel(x_ref, w1_ref, b1_ref, w2_ref, b2_ref,
                mem1_ref, mem2_ref, *, T, Bp, beta1, beta2):
    H = w1_ref.shape[1]
    O = w2_ref.shape[1]

    thr = jnp.float32(1.0)
    beta1 = jnp.float32(beta1)
    beta2 = jnp.float32(beta2)

    # Loop-invariant values, computed once (JAX does not CSE broadcasts).
    b1_eff = b1_ref[...] + jnp.float32(0.2)          # (1, H): fc1 bias + literal 0.2
    b2 = b2_ref[...]                                 # (1, O)

    # ---- layer-1 currents for ALL timesteps in one MXU push ----
    #   (T*Bp, I) @ (I, H) -> (T*Bp, H); no dependence on membrane state.
    cur1_all = (jnp.dot(x_ref[...], w1_ref[...],
                        preferred_element_type=jnp.float32) + b1_eff)

    # ---- mem1 recurrence: pure VPU, state carried in vregs ----
    # (lif.init_leaky() -> mem = 0).  Slices are 8-sublane aligned (Bp = 8k).
    mem1 = jnp.zeros((Bp, H), jnp.float32)
    mem1_blocks = []
    for t in range(T):
        reset1 = (mem1 > thr).astype(jnp.float32)    # spike of previous mem1
        mem1 = beta1 * mem1 + cur1_all[t * Bp:(t + 1) * Bp, :] - reset1 * thr
        mem1_blocks.append(mem1)
    mem1_all = jnp.concatenate(mem1_blocks, axis=0)  # (T*Bp, H), sublane-aligned concat

    # ---- layer-2 currents for ALL timesteps in one MXU push ----
    # spk1_t = (mem1_t > thr) has no dependence on mem2, so the whole layer-2
    # matmul leaves the serial chain.
    spk1_all = (mem1_all > thr).astype(jnp.float32)  # (T*Bp, H)
    cur2_all = (jnp.dot(spk1_all, w2_ref[...],
                        preferred_element_type=jnp.float32) + b2)

    # ---- mem2 recurrence: pure VPU ----
    mem2 = jnp.zeros((Bp, O), jnp.float32)
    mem2_blocks = []
    for t in range(T):
        reset2 = (mem2 > thr).astype(jnp.float32)
        mem2 = beta2 * mem2 + cur2_all[t * Bp:(t + 1) * Bp, :] - reset2 * thr
        mem2_blocks.append(mem2)
    mem2_all = jnp.concatenate(mem2_blocks, axis=0)  # (T*Bp, O)

    # ---- record: exactly two coalesced full-slab stores ----
    mem1_ref[...] = mem1_all
    mem2_ref[...] = mem2_all


def snn_forward(x, w1, b1, w2, b2, *, beta1, beta2):
    """x: (T, B, num_inputs) f32.

    Returns (spk1_rec (T,B,H), mem1_trace (T,), spk2_rec (T,B,O), mem2_rec (T,B,O)),
    mirroring the PyTorch forward's (stack(spk1_trace), mem1_trace, spk2_rec, mem2_rec).
    """
    T, B, num_inputs = x.shape
    H = w1.shape[1]
    O = w2.shape[1]

    # Pad the batch to a sublane multiple so all per-step slices inside the
    # kernel are (8,128)-tile aligned.  Padded rows are garbage and discarded.
    Bp = ((B + 7) // 8) * 8
    x_pad = jnp.pad(x, ((0, 0), (0, Bp - B), (0, 0)))
    x2d = x_pad.reshape(T * Bp, num_inputs)          # contiguous reshape

    b1 = b1.reshape(1, H)
    b2 = b2.reshape(1, O)

    kernel = functools.partial(_snn_kernel, T=T, Bp=Bp,
                               beta1=float(beta1), beta2=float(beta2))

    out_shapes = (
        jax.ShapeDtypeStruct((T * Bp, H), jnp.float32),   # full mem1 record
        jax.ShapeDtypeStruct((T * Bp, O), jnp.float32),   # full mem2 record
    )

    grid_spec = pltpu.PrefetchScalarGridSpec(
        num_scalar_prefetch=0,
        grid=(1,),                                   # single invocation; loop is in-kernel
        in_specs=[
            pl.BlockSpec((T * Bp, num_inputs), lambda i: (0, 0)),   # all timesteps of x
            pl.BlockSpec((num_inputs, H), lambda i: (0, 0)),        # W1
            pl.BlockSpec((1, H), lambda i: (0, 0)),                 # b1
            pl.BlockSpec((H, O), lambda i: (0, 0)),                 # W2
            pl.BlockSpec((1, O), lambda i: (0, 0)),                 # b2
        ],
        out_specs=[
            pl.BlockSpec((T * Bp, H), lambda i: (0, 0)),
            pl.BlockSpec((T * Bp, O), lambda i: (0, 0)),
        ],
    )

    mem1_all, mem2_all = pl.pallas_call(
        kernel,
        out_shape=out_shapes,
        grid_spec=grid_spec,
        compiler_params=pltpu.CompilerParams(
            dimension_semantics=("arbitrary",),
        ),
    )(x2d, w1, b1, w2, b2)

    # Wrapper-side unpacking (free layout plumbing in XLA).
    mem1_rec = mem1_all.reshape(T, Bp, H)[:, :B, :]
    mem2_rec = mem2_all.reshape(T, Bp, O)[:, :B, :]
    thr = jnp.float32(1.0)
    # Spikes recomputed bit-exactly from the stored membranes: the kernel used
    # the identical (mem > 1.0) comparison on the identical f32 values.
    spk1_rec = (mem1_rec > thr).astype(jnp.float32)
    spk2_rec = (mem2_rec > thr).astype(jnp.float32)
    # PyTorch: mem1_trace.append(mem1[0, 0].item()) each step -> length-T trace.
    mem1_trace = mem1_rec[:, 0, 0]
    return spk1_rec, mem1_trace, spk2_rec, mem2_rec


def snn_reference(x, w1, b1, w2, b2, *, beta1, beta2):
    """Pure-JAX reference (lax.scan). Returns full spk/mem records for checking."""
    T, B, _ = x.shape
    thr = 1.0

    def step(carry, x_t):
        m1, m2 = carry
        cur1 = x_t @ w1 + b1 + 0.2
        r1 = (m1 > thr).astype(jnp.float32)
        m1 = beta1 * m1 + cur1 - r1 * thr
        s1 = (m1 > thr).astype(jnp.float32)
        cur2 = s1 @ w2 + b2
        r2 = (m2 > thr).astype(jnp.float32)
        m2 = beta2 * m2 + cur2 - r2 * thr
        s2 = (m2 > thr).astype(jnp.float32)
        return (m1, m2), (s1, m1, s2, m2)

    init = (jnp.zeros((B, w1.shape[1]), jnp.float32),
            jnp.zeros((B, w2.shape[1]), jnp.float32))
    _, (s1, m1, s2, m2) = jax.lax.scan(step, init, x)
    return s1, m1, s2, m2


if __name__ == "__main__":
    # Small deterministic setup: T=8 timesteps, batch=2, 16 -> 32 -> 10.
    T, B = 8, 2
    num_inputs, num_hidden, num_outputs = 16, 32, 10
    beta1, beta2 = 0.9, 0.8

    key = jax.random.PRNGKey(0)
    kx, kw1, kb1, kw2, kb2 = jax.random.split(key, 5)

    x = jax.random.normal(kx, (T, B, num_inputs), dtype=jnp.float32)

    # Deterministic parameter init mimicking nn.Linear's uniform(-1/sqrt(fan_in), 1/sqrt(fan_in)).
    lim1 = 1.0 / (num_inputs ** 0.5)
    lim2 = 1.0 / (num_hidden ** 0.5)
    w1 = jax.random.uniform(kw1, (num_inputs, num_hidden), jnp.float32, -lim1, lim1)
    b1 = jax.random.uniform(kb1, (num_hidden,), jnp.float32, -lim1, lim1)
    w2 = jax.random.uniform(kw2, (num_hidden, num_outputs), jnp.float32, -lim2, lim2)
    b2 = jax.random.uniform(kb2, (num_outputs,), jnp.float32, -lim2, lim2)

    # NOTE: self.bias1 (=0.2 Parameter) is unused in the PyTorch forward (a literal 0.2 is
    # added instead), so it is intentionally not a kernel input.

    fwd = jax.jit(functools.partial(snn_forward, beta1=beta1, beta2=beta2))
    out = fwd(x, w1, b1, w2, b2)
    out = jax.block_until_ready(out)
    spk1_rec, mem1_trace, spk2_rec, mem2_rec = out

    ref_s1, ref_m1, ref_s2, ref_m2 = snn_reference(
        x, w1, b1.reshape(1, -1), w2, b2.reshape(1, -1), beta1=beta1, beta2=beta2)

    # Membrane comparisons: plain tolerance.
    assert mem1_trace.shape == (T,)
    assert jnp.allclose(mem1_trace, ref_m1[:, 0, 0], atol=1e-4), "mem1 trace mismatch"
    assert jnp.allclose(mem2_rec, ref_m2, atol=1e-4), "mem2 mismatch"

    # Spike comparisons: exact match required only where the reference membrane is
    # safely away from the threshold (hard-thresholded bits can legitimately flip
    # within float accumulation-order differences right at mem == 1.0).
    thr, margin = 1.0, 1e-3
    safe1 = jnp.abs(ref_m1 - thr) > margin
    safe2 = jnp.abs(ref_m2 - thr) > margin
    assert spk1_rec.shape == ref_s1.shape and spk2_rec.shape == ref_s2.shape
    assert bool(jnp.all(jnp.where(safe1, spk1_rec == ref_s1, True))), "spk1 mismatch"
    assert bool(jnp.all(jnp.where(safe2, spk2_rec == ref_s2, True))), "spk2 mismatch"

    print("KERNEL_OK")
</pallas_src>

<mosaic_0001>
module attributes {stable_mosaic.version = 11 : i64} {
  func.func @_snn_kernel(%arg0: i32, %arg1: memref<64x16xf32, #tpu.memory_space<vmem>>, %arg2: memref<16x32xf32, #tpu.memory_space<vmem>>, %arg3: memref<1x32xf32, #tpu.memory_space<vmem>>, %arg4: memref<32x10xf32, #tpu.memory_space<vmem>>, %arg5: memref<1x10xf32, #tpu.memory_space<vmem>>, %arg6: memref<64x32xf32, #tpu.memory_space<vmem>>, %arg7: memref<64x10xf32, #tpu.memory_space<vmem>>) attributes {dimension_semantics = [#tpu.dimension_semantics<arbitrary>], iteration_bounds = array<i64: 1>, scalar_prefetch = 0 : i64, scratch_operands = 0 : i64, tpu.core_type = #tpu.core_type<tc>, window_params = [{pipeline_mode = #tpu.pipeline_mode<synchronous>, transform_indices = @transform_0, window_bounds = array<i64: 64, 16>}, {pipeline_mode = #tpu.pipeline_mode<synchronous>, transform_indices = @transform_1, window_bounds = array<i64: 16, 32>}, {pipeline_mode = #tpu.pipeline_mode<synchronous>, transform_indices = @transform_2, window_bounds = array<i64: 1, 32>}, {pipeline_mode = #tpu.pipeline_mode<synchronous>, transform_indices = @transform_3, window_bounds = array<i64: 32, 10>}, {pipeline_mode = #tpu.pipeline_mode<synchronous>, transform_indices = @transform_4, window_bounds = array<i64: 1, 10>}, {pipeline_mode = #tpu.pipeline_mode<synchronous>, transform_indices = @transform_5, window_bounds = array<i64: 64, 32>}, {pipeline_mode = #tpu.pipeline_mode<synchronous>, transform_indices = @transform_6, window_bounds = array<i64: 64, 10>}]} {
    %c0 = arith.constant 0 : index
    %c0_0 = arith.constant 0 : index
    %0 = vector.load %arg3[%c0, %c0_0] : memref<1x32xf32, #tpu.memory_space<vmem>>, vector<1x32xf32>
    %cst = arith.constant 2.000000e-01 : f32
    %1 = vector.broadcast %cst : f32 to vector<1x32xf32>
    %2 = arith.addf %0, %1 : vector<1x32xf32>
    %c0_1 = arith.constant 0 : index
    %c0_2 = arith.constant 0 : index
    %3 = vector.load %arg5[%c0_1, %c0_2] : memref<1x10xf32, #tpu.memory_space<vmem>>, vector<1x10xf32>
    %c0_3 = arith.constant 0 : index
    %c0_4 = arith.constant 0 : index
    %4 = vector.load %arg1[%c0_3, %c0_4] : memref<64x16xf32, #tpu.memory_space<vmem>>, vector<64x16xf32>
    %c0_5 = arith.constant 0 : index
    %c0_6 = arith.constant 0 : index
    %5 = vector.load %arg2[%c0_5, %c0_6] : memref<16x32xf32, #tpu.memory_space<vmem>>, vector<16x32xf32>
    %cst_7 = arith.constant dense<0.000000e+00> : vector<64x32xf32>
    %6 = tpu.matmul %4, %5, %cst_7 {dimension_numbers = #tpu.dot_dimension_numbers<[1], [0], [0], [1], [0, 0, 1, 1], [], []>} : vector<64x16xf32>, vector<16x32xf32>, vector<64x32xf32> -> vector<64x32xf32>
    %7 = vector.broadcast %2 : vector<1x32xf32> to vector<64x32xf32>
    %8 = arith.addf %6, %7 : vector<64x32xf32>
    %cst_8 = arith.constant 0.000000e+00 : f32
    %9 = vector.broadcast %cst_8 : f32 to vector<8x32xf32>
    %cst_9 = arith.constant 1.000000e+00 : f32
    %10 = vector.broadcast %cst_9 : f32 to vector<8x32xf32>
    %11 = arith.cmpf ogt, %9, %10 : vector<8x32xf32>
    %12 = arith.extui %11 : vector<8x32xi1> to vector<8x32xi32>
    %13 = arith.sitofp %12 : vector<8x32xi32> to vector<8x32xf32>
    %cst_10 = arith.constant 0.899999976 : f32
    %14 = vector.broadcast %cst_10 : f32 to vector<8x32xf32>
    %15 = arith.mulf %14, %9 : vector<8x32xf32>
    %16 = vector.extract_strided_slice %8 {offsets = [0, 0], sizes = [8, 32], strides = [1, 1]} : vector<64x32xf32> to vector<8x32xf32>
    %17 = arith.addf %15, %16 : vector<8x32xf32>
    %cst_11 = arith.constant 1.000000e+00 : f32
    %18 = vector.broadcast %cst_11 : f32 to vector<8x32xf32>
    %19 = arith.mulf %13, %18 : vector<8x32xf32>
    %20 = arith.subf %17, %19 : vector<8x32xf32>
    %cst_12 = arith.constant 1.000000e+00 : f32
    %21 = vector.broadcast %cst_12 : f32 to vector<8x32xf32>
    %22 = arith.cmpf ogt, %20, %21 : vector<8x32xf32>
    %23 = arith.extui %22 : vector<8x32xi1> to vector<8x32xi32>
    %24 = arith.sitofp %23 : vector<8x32xi32> to vector<8x32xf32>
    %cst_13 = arith.constant 0.899999976 : f32
    %25 = vector.broadcast %cst_13 : f32 to vector<8x32xf32>
    %26 = arith.mulf %25, %20 : vector<8x32xf32>
    %27 = vector.extract_strided_slice %8 {offsets = [8, 0], sizes = [8, 32], strides = [1, 1]} : vector<64x32xf32> to vector<8x32xf32>
    %28 = arith.addf %26, %27 : vector<8x32xf32>
    %cst_14 = arith.constant 1.000000e+00 : f32
    %29 = vector.broadcast %cst_14 : f32 to vector<8x32xf32>
    %30 = arith.mulf %24, %29 : vector<8x32xf32>
    %31 = arith.subf %28, %30 : vector<8x32xf32>
    %cst_15 = arith.constant 1.000000e+00 : f32
    %32 = vector.broadcast %cst_15 : f32 to vector<8x32xf32>
    %33 = arith.cmpf ogt, %31, %32 : vector<8x32xf32>
    %34 = arith.extui %33 : vector<8x32xi1> to vector<8x32xi32>
    %35 = arith.sitofp %34 : vector<8x32xi32> to vector<8x32xf32>
    %cst_16 = arith.constant 0.899999976 : f32
    %36 = vector.broadcast %cst_16 : f32 to vector<8x32xf32>
    %37 = arith.mulf %36, %31 : vector<8x32xf32>
    %38 = vector.extract_strided_slice %8 {offsets = [16, 0], sizes = [8, 32], strides = [1, 1]} : vector<64x32xf32> to vector<8x32xf32>
    %39 = arith.addf %37, %38 : vector<8x32xf32>
    %cst_17 = arith.constant 1.000000e+00 : f32
    %40 = vector.broadcast %cst_17 : f32 to vector<8x32xf32>
    %41 = arith.mulf %35, %40 : vector<8x32xf32>
    %42 = arith.subf %39, %41 : vector<8x32xf32>
    %cst_18 = arith.constant 1.000000e+00 : f32
    %43 = vector.broadcast %cst_18 : f32 to vector<8x32xf32>
    %44 = arith.cmpf ogt, %42, %43 : vector<8x32xf32>
    %45 = arith.extui %44 : vector<8x32xi1> to vector<8x32xi32>
    %46 = arith.sitofp %45 : vector<8x32xi32> to vector<8x32xf32>
    %cst_19 = arith.constant 0.899999976 : f32
    %47 = vector.broadcast %cst_19 : f32 to vector<8x32xf32>
    %48 = arith.mulf %47, %42 : vector<8x32xf32>
    %49 = vector.extract_strided_slice %8 {offsets = [24, 0], sizes = [8, 32], strides = [1, 1]} : vector<64x32xf32> to vector<8x32xf32>
    %50 = arith.addf %48, %49 : vector<8x32xf32>
    %cst_20 = arith.constant 1.000000e+00 : f32
    %51 = vector.broadcast %cst_20 : f32 to vector<8x32xf32>
    %52 = arith.mulf %46, %51 : vector<8x32xf32>
    %53 = arith.subf %50, %52 : vector<8x32xf32>
    %cst_21 = arith.constant 1.000000e+00 : f32
    %54 = vector.broadcast %cst_21 : f32 to vector<8x32xf32>
    %55 = arith.cmpf ogt, %53, %54 : vector<8x32xf32>
    %56 = arith.extui %55 : vector<8x32xi1> to vector<8x32xi32>
    %57 = arith.sitofp %56 : vector<8x32xi32> to vector<8x32xf32>
    %cst_22 = arith.constant 0.899999976 : f32
    %58 = vector.broadcast %cst_22 : f32 to vector<8x32xf32>
    %59 = arith.mulf %58, %53 : vector<8x32xf32>
    %60 = vector.extract_strided_slice %8 {offsets = [32, 0], sizes = [8, 32], strides = [1, 1]} : vector<64x32xf32> to vector<8x32xf32>
    %61 = arith.addf %59, %60 : vector<8x32xf32>
    %cst_23 = arith.constant 1.000000e+00 : f32
    %62 = vector.broadcast %cst_23 : f32 to vector<8x32xf32>
    %63 = arith.mulf %57, %62 : vector<8x32xf32>
    %64 = arith.subf %61, %63 : vector<8x32xf32>
    %cst_24 = arith.constant 1.000000e+00 : f32
    %65 = vector.broadcast %cst_24 : f32 to vector<8x32xf32>
    %66 = arith.cmpf ogt, %64, %65 : vector<8x32xf32>
    %67 = arith.extui %66 : vector<8x32xi1> to vector<8x32xi32>
    %68 = arith.sitofp %67 : vector<8x32xi32> to vector<8x32xf32>
    %cst_25 = arith.constant 0.899999976 : f32
    %69 = vector.broadcast %cst_25 : f32 to vector<8x32xf32>
    %70 = arith.mulf %69, %64 : vector<8x32xf32>
    %71 = vector.extract_strided_slice %8 {offsets = [40, 0], sizes = [8, 32], strides = [1, 1]} : vector<64x32xf32> to vector<8x32xf32>
    %72 = arith.addf %70, %71 : vector<8x32xf32>
    %cst_26 = arith.constant 1.000000e+00 : f32
    %73 = vector.broadcast %cst_26 : f32 to vector<8x32xf32>
    %74 = arith.mulf %68, %73 : vector<8x32xf32>
    %75 = arith.subf %72, %74 : vector<8x32xf32>
    %cst_27 = arith.constant 1.000000e+00 : f32
    %76 = vector.broadcast %cst_27 : f32 to vector<8x32xf32>
    %77 = arith.cmpf ogt, %75, %76 : vector<8x32xf32>
    %78 = arith.extui %77 : vector<8x32xi1> to vector<8x32xi32>
    %79 = arith.sitofp %78 : vector<8x32xi32> to vector<8x32xf32>
    %cst_28 = arith.constant 0.899999976 : f32
    %80 = vector.broadcast %cst_28 : f32 to vector<8x32xf32>
    %81 = arith.mulf %80, %75 : vector<8x32xf32>
    %82 = vector.extract_strided_slice %8 {offsets = [48, 0], sizes = [8, 32], strides = [1, 1]} : vector<64x32xf32> to vector<8x32xf32>
    %83 = arith.addf %81, %82 : vector<8x32xf32>
    %cst_29 = arith.constant 1.000000e+00 : f32
    %84 = vector.broadcast %cst_29 : f32 to vector<8x32xf32>
    %85 = arith.mulf %79, %84 : vector<8x32xf32>
    %86 = arith.subf %83, %85 : vector<8x32xf32>
    %cst_30 = arith.constant 1.000000e+00 : f32
    %87 = vector.broadcast %cst_30 : f32 to vector<8x32xf32>
    %88 = arith.cmpf ogt, %86, %87 : vector<8x32xf32>
    %89 = arith.extui %88 : vector<8x32xi1> to vector<8x32xi32>
    %90 = arith.sitofp %89 : vector<8x32xi32> to vector<8x32xf32>
    %cst_31 = arith.constant 0.899999976 : f32
    %91 = vector.broadcast %cst_31 : f32 to vector<8x32xf32>
    %92 = arith.mulf %91, %86 : vector<8x32xf32>
    %93 = vector.extract_strided_slice %8 {offsets = [56, 0], sizes = [8, 32], strides = [1, 1]} : vector<64x32xf32> to vector<8x32xf32>
    %94 = arith.addf %92, %93 : vector<8x32xf32>
    %cst_32 = arith.constant 1.000000e+00 : f32
    %95 = vector.broadcast %cst_32 : f32 to vector<8x32xf32>
    %96 = arith.mulf %90, %95 : vector<8x32xf32>
    %97 = arith.subf %94, %96 : vector<8x32xf32>
    %98 = tpu.concatenate %20, %31, %42, %53, %64, %75, %86, %97 in 0 : vector<8x32xf32>, vector<8x32xf32>, vector<8x32xf32>, vector<8x32xf32>, vector<8x32xf32>, vector<8x32xf32>, vector<8x32xf32>, vector<8x32xf32> -> vector<64x32xf32>
    %cst_33 = arith.constant 1.000000e+00 : f32
    %99 = vector.broadcast %cst_33 : f32 to vector<64x32xf32>
    %100 = arith.cmpf ogt, %98, %99 : vector<64x32xf32>
    %101 = arith.extui %100 : vector<64x32xi1> to vector<64x32xi32>
    %102 = arith.sitofp %101 : vector<64x32xi32> to vector<64x32xf32>
    %c0_34 = arith.constant 0 : index
    %c0_35 = arith.constant 0 : index
    %103 = vector.load %arg4[%c0_34, %c0_35] : memref<32x10xf32, #tpu.memory_space<vmem>>, vector<32x10xf32>
    %cst_36 = arith.constant dense<0.000000e+00> : vector<64x10xf32>
    %104 = tpu.matmul %102, %103, %cst_36 {dimension_numbers = #tpu.dot_dimension_numbers<[1], [0], [0], [1], [0, 0, 1, 1], [], []>} : vector<64x32xf32>, vector<32x10xf32>, vector<64x10xf32> -> vector<64x10xf32>
    %105 = vector.broadcast %3 : vector<1x10xf32> to vector<64x10xf32>
    %106 = arith.addf %104, %105 : vector<64x10xf32>
    %cst_37 = arith.constant 0.000000e+00 : f32
    %107 = vector.broadcast %cst_37 : f32 to vector<8x10xf32>
    %cst_38 = arith.constant 1.000000e+00 : f32
    %108 = vector.broadcast %cst_38 : f32 to vector<8x10xf32>
    %109 = arith.cmpf ogt, %107, %108 : vector<8x10xf32>
    %110 = arith.extui %109 : vector<8x10xi1> to vector<8x10xi32>
    %111 = arith.sitofp %110 : vector<8x10xi32> to vector<8x10xf32>
    %cst_39 = arith.constant 8.000000e-01 : f32
    %112 = vector.broadcast %cst_39 : f32 to vector<8x10xf32>
    %113 = arith.mulf %112, %107 : vector<8x10xf32>
    %114 = vector.extract_strided_slice %106 {offsets = [0, 0], sizes = [8, 10], strides = [1, 1]} : vector<64x10xf32> to vector<8x10xf32>
    %115 = arith.addf %113, %114 : vector<8x10xf32>
    %cst_40 = arith.constant 1.000000e+00 : f32
    %116 = vector.broadcast %cst_40 : f32 to vector<8x10xf32>
    %117 = arith.mulf %111, %116 : vector<8x10xf32>
    %118 = arith.subf %115, %117 : vector<8x10xf32>
    %cst_41 = arith.constant 1.000000e+00 : f32
    %119 = vector.broadcast %cst_41 : f32 to vector<8x10xf32>
    %120 = arith.cmpf ogt, %118, %119 : vector<8x10xf32>
    %121 = arith.extui %120 : vector<8x10xi1> to vector<8x10xi32>
    %122 = arith.sitofp %121 : vector<8x10xi32> to vector<8x10xf32>
    %cst_42 = arith.constant 8.000000e-01 : f32
    %123 = vector.broadcast %cst_42 : f32 to vector<8x10xf32>
    %124 = arith.mulf %123, %118 : vector<8x10xf32>
    %125 = vector.extract_strided_slice %106 {offsets = [8, 0], sizes = [8, 10], strides = [1, 1]} : vector<64x10xf32> to vector<8x10xf32>
    %126 = arith.addf %124, %125 : vector<8x10xf32>
    %cst_43 = arith.constant 1.000000e+00 : f32
    %127 = vector.broadcast %cst_43 : f32 to vector<8x10xf32>
    %128 = arith.mulf %122, %127 : vector<8x10xf32>
    %129 = arith.subf %126, %128 : vector<8x10xf32>
    %cst_44 = arith.constant 1.000000e+00 : f32
    %130 = vector.broadcast %cst_44 : f32 to vector<8x10xf32>
    %131 = arith.cmpf ogt, %129, %130 : vector<8x10xf32>
    %132 = arith.extui %131 : vector<8x10xi1> to vector<8x10xi32>
    %133 = arith.sitofp %132 : vector<8x10xi32> to vector<8x10xf32>
    %cst_45 = arith.constant 8.000000e-01 : f32
    %134 = vector.broadcast %cst_45 : f32 to vector<8x10xf32>
    %135 = arith.mulf %134, %129 : vector<8x10xf32>
    %136 = vector.extract_strided_slice %106 {offsets = [16, 0], sizes = [8, 10], strides = [1, 1]} : vector<64x10xf32> to vector<8x10xf32>
    %137 = arith.addf %135, %136 : vector<8x10xf32>
    %cst_46 = arith.constant 1.000000e+00 : f32
    %138 = vector.broadcast %cst_46 : f32 to vector<8x10xf32>
    %139 = arith.mulf %133, %138 : vector<8x10xf32>
    %140 = arith.subf %137, %139 : vector<8x10xf32>
    %cst_47 = arith.constant 1.000000e+00 : f32
    %141 = vector.broadcast %cst_47 : f32 to vector<8x10xf32>
    %142 = arith.cmpf ogt, %140, %141 : vector<8x10xf32>
    %143 = arith.extui %142 : vector<8x10xi1> to vector<8x10xi32>
    %144 = arith.sitofp %143 : vector<8x10xi32> to vector<8x10xf32>
    %cst_48 = arith.constant 8.000000e-01 : f32
    %145 = vector.broadcast %cst_48 : f32 to vector<8x10xf32>
    %146 = arith.mulf %145, %140 : vector<8x10xf32>
    %147 = vector.extract_strided_slice %106 {offsets = [24, 0], sizes = [8, 10], strides = [1, 1]} : vector<64x10xf32> to vector<8x10xf32>
    %148 = arith.addf %146, %147 : vector<8x10xf32>
    %cst_49 = arith.constant 1.000000e+00 : f32
    %149 = vector.broadcast %cst_49 : f32 to vector<8x10xf32>
    %150 = arith.mulf %144, %149 : vector<8x10xf32>
    %151 = arith.subf %148, %150 : vector<8x10xf32>
    %cst_50 = arith.constant 1.000000e+00 : f32
    %152 = vector.broadcast %cst_50 : f32 to vector<8x10xf32>
    %153 = arith.cmpf ogt, %151, %152 : vector<8x10xf32>
    %154 = arith.extui %153 : vector<8x10xi1> to vector<8x10xi32>
    %155 = arith.sitofp %154 : vector<8x10xi32> to vector<8x10xf32>
    %cst_51 = arith.constant 8.000000e-01 : f32
    %156 = vector.broadcast %cst_51 : f32 to vector<8x10xf32>
    %157 = arith.mulf %156, %151 : vector<8x10xf32>
    %158 = vector.extract_strided_slice %106 {offsets = [32, 0], sizes = [8, 10], strides = [1, 1]} : vector<64x10xf32> to vector<8x10xf32>
    %159 = arith.addf %157, %158 : vector<8x10xf32>
    %cst_52 = arith.constant 1.000000e+00 : f32
    %160 = vector.broadcast %cst_52 : f32 to vector<8x10xf32>
    %161 = arith.mulf %155, %160 : vector<8x10xf32>
    %162 = arith.subf %159, %161 : vector<8x10xf32>
    %cst_53 = arith.constant 1.000000e+00 : f32
    %163 = vector.broadcast %cst_53 : f32 to vector<8x10xf32>
    %164 = arith.cmpf ogt, %162, %163 : vector<8x10xf32>
    %165 = arith.extui %164 : vector<8x10xi1> to vector<8x10xi32>
    %166 = arith.sitofp %165 : vector<8x10xi32> to vector<8x10xf32>
    %cst_54 = arith.constant 8.000000e-01 : f32
    %167 = vector.broadcast %cst_54 : f32 to vector<8x10xf32>
    %168 = arith.mulf %167, %162 : vector<8x10xf32>
    %169 = vector.extract_strided_slice %106 {offsets = [40, 0], sizes = [8, 10], strides = [1, 1]} : vector<64x10xf32> to vector<8x10xf32>
    %170 = arith.addf %168, %169 : vector<8x10xf32>
    %cst_55 = arith.constant 1.000000e+00 : f32
    %171 = vector.broadcast %cst_55 : f32 to vector<8x10xf32>
    %172 = arith.mulf %166, %171 : vector<8x10xf32>
    %173 = arith.subf %170, %172 : vector<8x10xf32>
    %cst_56 = arith.constant 1.000000e+00 : f32
    %174 = vector.broadcast %cst_56 : f32 to vector<8x10xf32>
    %175 = arith.cmpf ogt, %173, %174 : vector<8x10xf32>
    %176 = arith.extui %175 : vector<8x10xi1> to vector<8x10xi32>
    %177 = arith.sitofp %176 : vector<8x10xi32> to vector<8x10xf32>
    %cst_57 = arith.constant 8.000000e-01 : f32
    %178 = vector.broadcast %cst_57 : f32 to vector<8x10xf32>
    %179 = arith.mulf %178, %173 : vector<8x10xf32>
    %180 = vector.extract_strided_slice %106 {offsets = [48, 0], sizes = [8, 10], strides = [1, 1]} : vector<64x10xf32> to vector<8x10xf32>
    %181 = arith.addf %179, %180 : vector<8x10xf32>
    %cst_58 = arith.constant 1.000000e+00 : f32
    %182 = vector.broadcast %cst_58 : f32 to vector<8x10xf32>
    %183 = arith.mulf %177, %182 : vector<8x10xf32>
    %184 = arith.subf %181, %183 : vector<8x10xf32>
    %cst_59 = arith.constant 1.000000e+00 : f32
    %185 = vector.broadcast %cst_59 : f32 to vector<8x10xf32>
    %186 = arith.cmpf ogt, %184, %185 : vector<8x10xf32>
    %187 = arith.extui %186 : vector<8x10xi1> to vector<8x10xi32>
    %188 = arith.sitofp %187 : vector<8x10xi32> to vector<8x10xf32>
    %cst_60 = arith.constant 8.000000e-01 : f32
    %189 = vector.broadcast %cst_60 : f32 to vector<8x10xf32>
    %190 = arith.mulf %189, %184 : vector<8x10xf32>
    %191 = vector.extract_strided_slice %106 {offsets = [56, 0], sizes = [8, 10], strides = [1, 1]} : vector<64x10xf32> to vector<8x10xf32>
    %192 = arith.addf %190, %191 : vector<8x10xf32>
    %cst_61 = arith.constant 1.000000e+00 : f32
    %193 = vector.broadcast %cst_61 : f32 to vector<8x10xf32>
    %194 = arith.mulf %188, %193 : vector<8x10xf32>
    %195 = arith.subf %192, %194 : vector<8x10xf32>
    %196 = tpu.concatenate %118, %129, %140, %151, %162, %173, %184, %195 in 0 : vector<8x10xf32>, vector<8x10xf32>, vector<8x10xf32>, vector<8x10xf32>, vector<8x10xf32>, vector<8x10xf32>, vector<8x10xf32>, vector<8x10xf32> -> vector<64x10xf32>
    %c0_62 = arith.constant 0 : index
    %c0_63 = arith.constant 0 : index
    %197 = vector.load %arg6[%c0_62, %c0_63] : memref<64x32xf32, #tpu.memory_space<vmem>>, vector<64x32xf32>
    tpu.vector_store %arg6[%c0_62, %c0_63], %98 {strides = array<i32>} : memref<64x32xf32, #tpu.memory_space<vmem>>, vector<64x32xf32>,
    %c0_64 = arith.constant 0 : index
    %c0_65 = arith.constant 0 : index
    %198 = vector.load %arg7[%c0_64, %c0_65] : memref<64x10xf32, #tpu.memory_space<vmem>>, vector<64x10xf32>
    tpu.vector_store %arg7[%c0_64, %c0_65], %196 {strides = array<i32>} : memref<64x10xf32, #tpu.memory_space<vmem>>, vector<64x10xf32>,
    return
  }
  func.func @transform_0(%arg0: i32) -> (i32, i32) {
    %c0_i32 = arith.constant 0 : i32
    %c0_i32_0 = arith.constant 0 : i32
    %c0_i32_1 = arith.constant 0 : i32
    return %c0_i32, %c0_i32_0 : i32, i32
  }
  func.func @transform_1(%arg0: i32) -> (i32, i32) {
    %c0_i32 = arith.constant 0 : i32
    %c0_i32_0 = arith.constant 0 : i32
    %c0_i32_1 = arith.constant 0 : i32
    return %c0_i32, %c0_i32_0 : i32, i32
  }
  func.func @transform_2(%arg0: i32) -> (i32, i32) {
    %c0_i32 = arith.constant 0 : i32
    %c0_i32_0 = arith.constant 0 : i32
    %c0_i32_1 = arith.constant 0 : i32
    return %c0_i32, %c0_i32_0 : i32, i32
  }
  func.func @transform_3(%arg0: i32) -> (i32, i32) {
    %c0_i32 = arith.constant 0 : i32
    %c0_i32_0 = arith.constant 0 : i32
    %c0_i32_1 = arith.constant 0 : i32
    return %c0_i32, %c0_i32_0 : i32, i32
  }
  func.func @transform_4(%arg0: i32) -> (i32, i32) {
    %c0_i32 = arith.constant 0 : i32
    %c0_i32_0 = arith.constant 0 : i32
    %c0_i32_1 = arith.constant 0 : i32
    return %c0_i32, %c0_i32_0 : i32, i32
  }
  func.func @transform_5(%arg0: i32) -> (i32, i32) {
    %c0_i32 = arith.constant 0 : i32
    %c0_i32_0 = arith.constant 0 : i32
    %c0_i32_1 = arith.constant 0 : i32
    return %c0_i32, %c0_i32_0 : i32, i32
  }
  func.func @transform_6(%arg0: i32) -> (i32, i32) {
    %c0_i32 = arith.constant 0 : i32
    %c0_i32_0 = arith.constant 0 : i32
    %c0_i32_1 = arith.constant 0 : i32
    return %c0_i32, %c0_i32_0 : i32, i32
  }
}

</mosaic_0001>

<bundles_post_ra>
// kernel: snn_forward.1
= control target key start
LH: loop header
LB: loop body
LE: loop exit
PB: predicated region body
PF: predicated region fallthrough
CT: control target
= control target key end

     0   :  { %vm41_vm0 = vcmask 130048   ;;  %v36_v17 = vlaneseq  ;;  %vm231_vm1 = vcmask 261120   ;;  %v533_v29 = vmov 0.0   ;;  %s712_s1 = inlined_call_operand.vmem [shape: f32[16,32], index: 1, kind: input, shape index: {}]   ;;  %s713_s0 = inlined_call_operand.vmem [shape: f32[64,16], index: 0, kind: input, shape index: {}]   ;;  %s714_s3 = inlined_call_operand.vmem [shape: f32[32,10], index: 3, kind: input, shape index: {}]   ;;  %s715_s2 = inlined_call_operand.vmem [shape: f32[1,32], index: 2, kind: input, shape index: {}]   ;;  %s716_s5 = inlined_call_operand.vmem [shape: f32[64,32], index: 5, kind: output, shape index: {0}]   ;;  %s717_s4 = inlined_call_operand.vmem [shape: f32[1,10], index: 4, kind: input, shape index: {}]   ;;  %s718_s6 = inlined_call_operand.vmem [shape: f32[64,10], index: 6, kind: output, shape index: {1}]  }
   0x1   :  { %v33_v0 = vld [vmem:[%s712_s1] sm:$0xff]  ;;  %v34_v1 = vld [vmem:[%s712_s1 + $0x8] sm:$0xff]  ;;  %v27_v5 = vld [vmem:[%s713_s0 + $0x10] sm:$0xff]  ;;  %vm413_vm10 = vcmask 80896  }
   0x2   :  { %v25_v2 = vld [vmem:[%s713_s0] sm:$0xff]  ;;  %v520_v3 = vpack.c.bf16 %v34_v1, %v33_v0  ;;  %v26_v4 = vld [vmem:[%s713_s0 + $0x8] sm:$0xff]  ;;  %v28_v6 = vld [vmem:[%s713_s0 + $0x18] sm:$0xff]  ;;  %v37_v18 = vshrl.u32 %v36_v17, 7 }
   0x3   :  { %488 = vmatprep.mubr.msk.f32.mxu0 %vm41_vm0, %v25_v2  ;;  %v29_v7 = vld [vmem:[%s713_s0 + $0x20] sm:$0xff]  ;;  %v30_v8 = vld [vmem:[%s713_s0 + $0x28] sm:$0xff]  ;;  %v31_v9 = vld [vmem:[%s713_s0 + $0x30] sm:$0xff] }
   0x4   :  { %521 = vmatprep.subr.bf16.mxu0 %v520_v3  ;;  %v32_v10 = vld [vmem:[%s713_s0 + $0x38] sm:$0xff]  ;;  %v221_v11 = vld [vmem:[%s714_s3] sm:$0xff]  ;;  %v222_v12 = vld [vmem:[%s714_s3 + $0x8] sm:$0xff]  ;;  %v38_v21 = vsub.s32 0, %v37_v18 }
   0x5   :  { %523 = vmatpush3.bf16.msra.mxu0 %v520_v3  ;;  %v524_v13 = vpack.c.bf16 %v222_v12, %v221_v11  ;;  %v223_v14 = vld [vmem:[%s714_s3 + $0x10] sm:$0xff]  ;;  %v224_v15 = vld [vmem:[%s714_s3 + $0x18] sm:$0xff]  ;;  %v22_v19 = vld [vmem:[%s715_s2] sm:$0x1] }
   0x6   :  { %v528_v16 = vpack.c.bf16 %v224_v15, %v223_v14  ;;  %v23_v20 = vadd.f32 0.2, %v22_v19 }
   0x7   :  { %525 = vmatprep.subr.bf16.mxu1 %v524_v13 }
   0x8   :  { %489 = vmatmul.mubr.msk.f32.vlgmr.msra.gmra.mrb[0].mxu0 %vm41_vm0, %v26_v4  ;;  %527 = vmatpush3.bf16.msra.mxu1 %v524_v13  ;;  %v39_v22 = vrot.slane %v23_v20, %v38_v21 }
   0x9   :  { %491 = vmatprep.mubr.msk.f32.mxu0 %vm41_vm0, %v27_v5  ;;  %529 = vmatprep.subr.bf16.mxu1 %v528_v16  ;;  %v446_v5 = vld [vmem:[%s717_s4] ss:$0 sm:$0xff] }
   0xc   :  { %492 = vmatmul.mubr.msk.f32.gmra.mrb[2].mxu0 %vm41_vm0, %v28_v6  ;;  %531 = vmatpush3.bf16.msra.mxu1 %v528_v16 }
   0xd   :  { %494 = vmatprep.mubr.msk.f32.mxu0 %vm41_vm0, %v29_v7 }
  0x10   :  { %495 = vmatmul.mubr.msk.f32.gmra.mrb[4].mxu0 %vm41_vm0, %v30_v8 }
  0x11   :  { %497 = vmatprep.mubr.msk.f32.mxu0 %vm41_vm0, %v31_v9 }
  0x14   :  { %498 = vmatmul.mubr.msk.f32.gmra.mrb[6].mxu0 %vm41_vm0, %v32_v10 }
  0xdb   :  { %v490_v23 = vpop.f32.mrb[0].mxu0 }
  0xdc   :  { %v132_v24 = vpop.f32.mrb[1].mxu0  ;;  %v138_v26 = vadd.f32 %v490_v23, %v39_v22 }
  0xdd   :  { %v133_v25 = vadd.f32 %v132_v24, %v39_v22 }
  0xdf   :  { %v179_v27 = vmul.f32 0.9, %v133_v25  ;;  %405 = vst.msk [vmem:[%s716_s5] sm:$0xff] %vm231_vm1, %v133_v25  ;;  %vm176_vm2 = vcmp.gt.f32.partialorder %v133_v25, 1.0  ;;  %v493_v28 = vpop.f32.mrb[2].mxu0 }
  0xe0   :  { %v438_v30 = vsel %vm176_vm2, 1.0, %v533_v29  ;;  %v142_v31 = vpop.f32.mrb[3].mxu0  ;;  %v148_v43 = vadd.f32 %v493_v28, %v39_v22 }
  0xe1   :  { %v180_v32 = vadd.f32 %v179_v27, %v138_v26  ;;  %508 = vmatprep.mubr.msk.f32.mxu1 %vm231_vm1, %v438_v30  ;;  %v143_v34 = vadd.f32 %v142_v31, %v39_v22 }
  0xe3   :  { %v181_v33 = vsub.f32 %v180_v32, %v438_v30  ;;  %v496_v35 = vpop.f32.mrb[4].mxu0 }
  0xe4   :  { %v152_v36 = vpop.f32.mrb[5].mxu0  ;;  %v158_v53 = vadd.f32 %v496_v35, %v39_v22 }
  0xe5   :  { %406 = vst.msk [vmem:[%s716_s5 + $0x8] sm:$0xff] %vm231_vm1, %v181_v33  ;;  %v185_v37 = vmul.f32 0.9, %v181_v33  ;;  %vm182_vm3 = vcmp.gt.f32.partialorder %v181_v33, 1.0  ;;  %v153_v48 = vadd.f32 %v152_v36, %v39_v22 }
  0xe6   :  { %v439_v38 = vsel %vm182_vm3, 1.0, %v533_v29 }
  0xe7   :  { %v186_v39 = vadd.f32 %v185_v37, %v143_v34  ;;  %509 = vmatmul.mubr.msk.f32.vlgmr.msra.gmra.mrb[0].mxu1 %vm231_vm1, %v439_v38  ;;  %v499_v40 = vpop.f32.mrb[6].mxu0 }
  0xe8   :  { %v162_v41 = vpop.f32.mrb[7].mxu0  ;;  %v168_v63 = vadd.f32 %v499_v40, %v39_v22 }
  0xe9   :  { %v187_v42 = vsub.f32 %v186_v39, %v439_v38  ;;  %v163_v58 = vadd.f32 %v162_v41, %v39_v22 }
  0xeb   :  { %407 = vst.msk [vmem:[%s716_s5 + $0x10] sm:$0xff] %vm231_vm1, %v187_v42  ;;  %vm188_vm4 = vcmp.gt.f32.partialorder %v187_v42, 1.0  ;;  %v191_v44 = vmul.f32 0.9, %v187_v42 }
  0xec   :  { %v440_v45 = vsel %vm188_vm4, 1.0, %v533_v29 }
  0xed   :  { %v192_v46 = vadd.f32 %v191_v44, %v148_v43  ;;  %511 = vmatprep.mubr.msk.f32.mxu1 %vm231_vm1, %v440_v45 }
  0xef   :  { %v193_v47 = vsub.f32 %v192_v46, %v440_v45 }
  0xf1   :  { %408 = vst.msk [vmem:[%s716_s5 + $0x18] sm:$0xff] %vm231_vm1, %v193_v47  ;;  %v197_v49 = vmul.f32 0.9, %v193_v47  ;;  %vm194_vm5 = vcmp.gt.f32.partialorder %v193_v47, 1.0 }
  0xf2   :  { %v441_v50 = vsel %vm194_vm5, 1.0, %v533_v29 }
  0xf3   :  { %v198_v51 = vadd.f32 %v197_v49, %v153_v48  ;;  %512 = vmatmul.mubr.msk.f32.gmra.mrb[2].mxu1 %vm231_vm1, %v441_v50 }
  0xf5   :  { %v199_v52 = vsub.f32 %v198_v51, %v441_v50 }
  0xf7   :  { %409 = vst.msk [vmem:[%s716_s5 + $0x20] sm:$0xff] %vm231_vm1, %v199_v52  ;;  %vm200_vm6 = vcmp.gt.f32.partialorder %v199_v52, 1.0  ;;  %v203_v54 = vmul.f32 0.9, %v199_v52 }
  0xf8   :  { %v442_v55 = vsel %vm200_vm6, 1.0, %v533_v29 }
  0xf9   :  { %v204_v56 = vadd.f32 %v203_v54, %v158_v53  ;;  %514 = vmatprep.mubr.msk.f32.mxu1 %vm231_vm1, %v442_v55 }
  0xfb   :  { %v205_v57 = vsub.f32 %v204_v56, %v442_v55 }
  0xfd   :  { %410 = vst.msk [vmem:[%s716_s5 + $0x28] sm:$0xff] %vm231_vm1, %v205_v57  ;;  %v209_v59 = vmul.f32 0.9, %v205_v57  ;;  %vm206_vm7 = vcmp.gt.f32.partialorder %v205_v57, 1.0 }
  0xfe   :  { %v443_v60 = vsel %vm206_vm7, 1.0, %v533_v29 }
  0xff   :  { %v210_v61 = vadd.f32 %v209_v59, %v163_v58  ;;  %515 = vmatmul.mubr.msk.f32.gmra.mrb[4].mxu1 %vm231_vm1, %v443_v60 }
 0x101   :  { %v211_v62 = vsub.f32 %v210_v61, %v443_v60 }
 0x103   :  { %411 = vst.msk [vmem:[%s716_s5 + $0x30] sm:$0xff] %vm231_vm1, %v211_v62  ;;  %vm212_vm8 = vcmp.gt.f32.partialorder %v211_v62, 1.0  ;;  %v215_v0 = vmul.f32 0.9, %v211_v62 }
 0x104   :  { %v444_v1 = vsel %vm212_vm8, 1.0, %v533_v29 }
 0x105   :  { %v216_v2 = vadd.f32 %v215_v0, %v168_v63  ;;  %517 = vmatprep.mubr.msk.f32.mxu1 %vm231_vm1, %v444_v1 }
 0x107   :  { %v217_v3 = vsub.f32 %v216_v2, %v444_v1 }
 0x109   :  { %412 = vst.msk [vmem:[%s716_s5 + $0x38] sm:$0xff] %vm231_vm1, %v217_v3  ;;  %vm218_vm9 = vcmp.gt.f32.partialorder %v217_v3, 1.0 }
 0x10a   :  { %v445_v4 = vsel %vm218_vm9, 1.0, %v533_v29 }
 0x10b   :  { %518 = vmatmul.mubr.msk.f32.gmra.mrb[6].mxu1 %vm231_vm1, %v445_v4 }
 0x1ba   :  { %v510_v6 = vpop.f32.mrb[0].mxu1 }
 0x1bb   :  { %v322_v7 = vpop.f32.mrb[1].mxu1  ;;  %v328_v9 = vadd.f32 %v510_v6, %v446_v5 }
 0x1bc   :  { %v323_v8 = vadd.f32 %v446_v5, %v322_v7 }
 0x1be   :  { %vm363_vm11 = vcmp.gt.f32.partialorder %v323_v8, 1.0  ;;  %v366_v10 = vmul.f32 0.8, %v323_v8  ;;  %414 = vst.msk [vmem:[%s718_s6] sm:$0xff] %vm413_vm10, %v323_v8 }
 0x1bf   :  { %v455_v12 = vsel %vm363_vm11, 1.0, %v533_v29 }
 0x1c0   :  { %v367_v11 = vadd.f32 %v366_v10, %v328_v9 }
 0x1c2   :  { %v368_v13 = vsub.f32 %v367_v11, %v455_v12 }
 0x1c4   :  { %415 = vst.msk [vmem:[%s718_s6 + $0x8] sm:$0xff] %vm413_vm10, %v368_v13  ;;  %vm369_vm12 = vcmp.gt.f32.partialorder %v368_v13, 1.0  ;;  %v372_v17 = vmul.f32 0.8, %v368_v13 }
 0x1c5   :  { %v456_v19 = vsel %vm369_vm12, 1.0, %v533_v29 }
 0x1c6   :  { %v513_v14 = vpop.f32.mrb[2].mxu1 }
 0x1c7   :  { %v332_v15 = vpop.f32.mrb[3].mxu1  ;;  %v338_v21 = vadd.f32 %v513_v14, %v446_v5 }
 0x1c8   :  { %v333_v16 = vadd.f32 %v446_v5, %v332_v15 }
 0x1ca   :  { %v373_v18 = vadd.f32 %v372_v17, %v333_v16 }
 0x1cc   :  { %v374_v20 = vsub.f32 %v373_v18, %v456_v19 }
 0x1ce   :  { %vm375_vm13 = vcmp.gt.f32.partialorder %v374_v20, 1.0  ;;  %v378_v22 = vmul.f32 0.8, %v374_v20  ;;  %416 = vst.msk [vmem:[%s718_s6 + $0x10] sm:$0xff] %vm413_vm10, %v374_v20 }
 0x1cf   :  { %v457_v24 = vsel %vm375_vm13, 1.0, %v533_v29 }
 0x1d0   :  { %v379_v23 = vadd.f32 %v378_v22, %v338_v21 }
 0x1d2   :  { %v516_v25 = vpop.f32.mrb[4].mxu1  ;;  %v380_v26 = vsub.f32 %v379_v23, %v457_v24 }
 0x1d3   :  { %v342_v27 = vpop.f32.mrb[5].mxu1  ;;  %v348_v34 = vadd.f32 %v516_v25, %v446_v5 }
 0x1d4   :  { %v343_v28 = vadd.f32 %v446_v5, %v342_v27  ;;  %vm381_vm14 = vcmp.gt.f32.partialorder %v380_v26, 1.0  ;;  %v384_v30 = vmul.f32 0.8, %v380_v26  ;;  %417 = vst.msk [vmem:[%s718_s6 + $0x18] sm:$0xff] %vm413_vm10, %v380_v26 }
 0x1d5   :  { %v458_v32 = vsel %vm381_vm14, 1.0, %v533_v29 }
 0x1d6   :  { %v385_v31 = vadd.f32 %v384_v30, %v343_v28 }
 0x1d8   :  { %v386_v33 = vsub.f32 %v385_v31, %v458_v32 }
 0x1da   :  { %vm387_vm15 = vcmp.gt.f32.partialorder %v386_v33, 1.0  ;;  %v390_v35 = vmul.f32 0.8, %v386_v33  ;;  %418 = vst.msk [vmem:[%s718_s6 + $0x20] sm:$0xff] %vm413_vm10, %v386_v33 }
 0x1db   :  { %v459_v37 = vsel %vm387_vm15, 1.0, %v533_v29 }
 0x1dc   :  { %v391_v36 = vadd.f32 %v390_v35, %v348_v34 }
 0x1de   :  { %v519_v38 = vpop.f32.mrb[6].mxu1  ;;  %v392_v39 = vsub.f32 %v391_v36, %v459_v37 }
 0x1df   :  { %v352_v40 = vpop.f32.mrb[7].mxu1  ;;  %v358_v46 = vadd.f32 %v519_v38, %v446_v5 }
 0x1e0   :  { %v353_v41 = vadd.f32 %v446_v5, %v352_v40  ;;  %vm393_vm0 = vcmp.gt.f32.partialorder %v392_v39, 1.0  ;;  %v396_v42 = vmul.f32 0.8, %v392_v39  ;;  %419 = vst.msk [vmem:[%s718_s6 + $0x28] sm:$0xff] %vm413_vm10, %v392_v39 }
 0x1e1   :  { %v460_v44 = vsel %vm393_vm0, 1.0, %v533_v29 }
 0x1e2   :  { %v397_v43 = vadd.f32 %v396_v42, %v353_v41 }
 0x1e4   :  { %v398_v45 = vsub.f32 %v397_v43, %v460_v44 }
 0x1e6   :  { %vm399_vm1 = vcmp.gt.f32.partialorder %v398_v45, 1.0  ;;  %v402_v47 = vmul.f32 0.8, %v398_v45  ;;  %420 = vst.msk [vmem:[%s718_s6 + $0x30] sm:$0xff] %vm413_vm10, %v398_v45 }
 0x1e7   :  { %v461_v49 = vsel %vm399_vm1, 1.0, %v533_v29 }
 0x1e8   :  { %v403_v48 = vadd.f32 %v402_v47, %v358_v46 }
 0x1ea   :  { %v404_v50 = vsub.f32 %v403_v48, %v461_v49 }
 0x1ec   :  { %421 = vst.msk [vmem:[%s718_s6 + $0x38] sm:$0xff] %vm413_vm10, %v404_v50 }

</bundles_post_ra>
